<compile_context>
chip_gen: v5e
topology: v5e:2x2
jax: 0.10.0
libtpu: 0.0.40
codegen_flags: <defaults>
</compile_context>

<pallas_src>
import numpy as np
import jax
import jax.numpy as jnp
from jax.experimental import pallas as pl
from jax.experimental.pallas import tpu as pltpu


def _band_matrix(l, l_out, kernel_size, stride, pad):
    """A[i, j] = weight of x[:, j, :] in output i (replicate-pad folded in)."""
    k = np.arange(kernel_size)[None, :]
    i = np.arange(l_out)[:, None]
    src = np.clip(i * stride + k - pad, 0, l - 1)            # (L_out, K)
    a = np.zeros((l_out, l), np.float32)
    np.add.at(a, (np.broadcast_to(i, src.shape), src), 1.0 / kernel_size)
    return jnp.asarray(a)


def _moving_avg_kernel(a_ref, x_ref, o_ref):
    """One grid step: (TB, L, TC) -> (TB, TC, L_out).

    a_ref: (L_out, L) f32 banded averaging matrix (constant across the grid).
    x_ref: (TB, L, TC) raw input tile (time on sublanes, channels on lanes).
    o_ref: (TB, TC, L_out) channel-first pooled output tile.
    """
    a = a_ref[...]                                            # stays in VMEM
    tb = x_ref.shape[0]
    for b in range(tb):                                       # static unroll, TB small
        xb = x_ref[b].astype(jnp.float32)                     # (L, TC)
        yb = jnp.dot(a, xb, preferred_element_type=jnp.float32)  # MXU, (L_out, TC)
        o_ref[b] = yb.T.astype(o_ref.dtype)                   # one XLU transpose


def _pick_tiles(b, l, c, l_out, itemsize, budget_bytes=4 << 20):
    """Pick (TB, TC): lane-aligned channel tile, batch folded up to ~budget."""
    if c % 128 == 0:
        tc = c
        while tc > 128 and l * tc * itemsize > budget_bytes and (tc // 2) % 128 == 0:
            tc //= 2
    else:
        tc = c                      # odd / small C: full-dim block is legal
    per_batch = (l * tc + tc * l_out) * itemsize
    cap = max(1, budget_bytes // max(per_batch, 1))
    tb = 1
    for d in range(1, b + 1):
        if b % d == 0 and d <= cap:
            tb = d
    # Megacore (v7x, 2 TCs): guarantee >= 2 grid points when possible.
    if (b // tb) * (c // tc) < 2:
        if b >= 2:
            best = 1
            for d in range(1, b // 2 + 1):
                if b % d == 0:
                    best = d
            tb = best
        elif tc % 256 == 0:
            tc //= 2
    return tb, tc


def moving_avg(x, kernel_size, stride):
    """x: [B, L, C] -> [B, C, L_out]  (matches the given module's return)."""
    b, l, c = x.shape
    pad = (kernel_size - 1) // 2
    l_pad = l + 2 * pad
    l_out = (l_pad - kernel_size) // stride + 1
    itemsize = x.dtype.itemsize

    a = _band_matrix(l, l_out, kernel_size, stride, pad)
    tb, tc = _pick_tiles(b, l, c, l_out, itemsize)
    grid = (b // tb, c // tc)

    in_specs = [
        pl.BlockSpec((l_out, l), lambda i, j: (0, 0)),        # A: fetched once
        pl.BlockSpec((tb, l, tc), lambda i, j: (i, 0, j)),    # x tile
    ]
    out_specs = pl.BlockSpec((tb, tc, l_out), lambda i, j: (i, j, 0))

    a_bytes = l_out * l * 4
    in_block = tb * l * tc * itemsize
    out_block = tb * tc * l_out * itemsize
    vmem_bytes = int(2 * (in_block + out_block + a_bytes) + (4 << 20))
    vmem_bytes = min(max(vmem_bytes, 16 << 20), 64 << 20)

    cost = pl.CostEstimate(
        flops=int(2 * b * c * l_out * l),
        transcendentals=0,
        bytes_accessed=int(x.size * itemsize + b * c * l_out * itemsize + a_bytes),
    )

    return pl.pallas_call(
        _moving_avg_kernel,
        out_shape=jax.ShapeDtypeStruct((b, c, l_out), x.dtype),
        grid_spec=pltpu.PrefetchScalarGridSpec(
            num_scalar_prefetch=0,
            grid=grid,
            in_specs=in_specs,
            out_specs=out_specs,
        ),
        compiler_params=pltpu.CompilerParams(
            dimension_semantics=("parallel", "parallel"),
            vmem_limit_bytes=vmem_bytes,
        ),
        cost_estimate=cost,
    )(a, x)


def _moving_avg_ref(x, kernel_size, stride):
    """Pure-JAX reference replicating the PyTorch forward exactly."""
    b, l, c = x.shape
    pad = (kernel_size - 1) // 2
    front = jnp.repeat(x[:, 0:1, :], pad, axis=1)
    end = jnp.repeat(x[:, l - 1:l, :], pad, axis=1)
    xp = jnp.concatenate([front, x, end], axis=1)             # [B, L_pad, C]
    l_pad = xp.shape[1]
    l_out = (l_pad - kernel_size) // stride + 1
    acc = jnp.zeros((b, l_out, c), jnp.float32)
    for k in range(kernel_size):
        acc = acc + xp[:, k:k + (l_out - 1) * stride + 1:stride, :].astype(jnp.float32)
    out = (acc * (1.0 / kernel_size)).astype(x.dtype)
    return jnp.transpose(out, (0, 2, 1))                      # [B, C, L_out]


if __name__ == "__main__":
    key = jax.random.PRNGKey(0)

    # Autoformer's canonical decomposition window.
    B, L, C = 2, 128, 128
    kernel_size, stride = 25, 1
    x = jax.random.normal(key, (B, L, C), dtype=jnp.float32)
    y = jax.block_until_ready(moving_avg(x, kernel_size, stride))
    y_ref = _moving_avg_ref(x, kernel_size, stride)
    assert y.shape == y_ref.shape, (y.shape, y_ref.shape)
    assert jnp.allclose(y, y_ref, atol=1e-4, rtol=1e-4), float(
        jnp.max(jnp.abs(y - y_ref)))

    # Even kernel size + stride > 1 goes through the same banded-matrix path.
    B2, L2, C2 = 2, 64, 128
    x2 = jax.random.normal(jax.random.PRNGKey(0), (B2, L2, C2), dtype=jnp.float32)
    y2 = jax.block_until_ready(moving_avg(x2, kernel_size=4, stride=2))
    y2_ref = _moving_avg_ref(x2, 4, 2)
    assert y2.shape == y2_ref.shape, (y2.shape, y2_ref.shape)
    assert jnp.allclose(y2, y2_ref, atol=1e-4, rtol=1e-4), float(
        jnp.max(jnp.abs(y2 - y2_ref)))

    print("KERNEL_OK")
</pallas_src>

<mosaic_0001>
module attributes {stable_mosaic.version = 11 : i64} {
  func.func @_moving_avg_kernel(%arg0: i32, %arg1: i32, %arg2: memref<128x128xf32, #tpu.memory_space<vmem>>, %arg3: memref<1x128x128xf32, #tpu.memory_space<vmem>>, %arg4: memref<1x128x128xf32, #tpu.memory_space<vmem>>) attributes {dimension_semantics = [#tpu.dimension_semantics<parallel>, #tpu.dimension_semantics<parallel>], iteration_bounds = array<i64: 2, 1>, scalar_prefetch = 0 : i64, scratch_operands = 0 : i64, tpu.core_type = #tpu.core_type<tc>, window_params = [{pipeline_mode = #tpu.pipeline_mode<synchronous>, transform_indices = @transform_0, window_bounds = array<i64: 128, 128>}, {transform_indices = @transform_1, window_bounds = array<i64: 1, 128, 128>}, {transform_indices = @transform_2, window_bounds = array<i64: 1, 128, 128>}]} {
    %c0 = arith.constant 0 : index
    %c0_0 = arith.constant 0 : index
    %0 = vector.load %arg2[%c0, %c0_0] : memref<128x128xf32, #tpu.memory_space<vmem>>, vector<128x128xf32>
    %c0_1 = arith.constant 0 : index
    %c0_2 = arith.constant 0 : index
    %c0_3 = arith.constant 0 : index
    %1 = vector.load %arg3[%c0_1, %c0_2, %c0_3] : memref<1x128x128xf32, #tpu.memory_space<vmem>>, vector<1x128x128xf32>
    %2 = vector.shape_cast %1 : vector<1x128x128xf32> to vector<128x128xf32>
    %cst = arith.constant dense<0.000000e+00> : vector<128x128xf32>
    %3 = tpu.matmul %0, %2, %cst {dimension_numbers = #tpu.dot_dimension_numbers<[1], [0], [0], [1], [0, 0, 1, 1], [], []>} : vector<128x128xf32>, vector<128x128xf32>, vector<128x128xf32> -> vector<128x128xf32>
    %4 = tpu.transpose %3, [1, 0] : vector<128x128xf32> -> vector<128x128xf32>
    %c0_4 = arith.constant 0 : index
    %c0_5 = arith.constant 0 : index
    %c0_6 = arith.constant 0 : index
    %5 = vector.load %arg4[%c0_4, %c0_5, %c0_6] : memref<1x128x128xf32, #tpu.memory_space<vmem>>, vector<1x128x128xf32>
    %6 = vector.shape_cast %5 : vector<1x128x128xf32> to vector<128x128xf32>
    %7 = vector.shape_cast %4 : vector<128x128xf32> to vector<1x128x128xf32>
    tpu.vector_store %arg4[%c0_4, %c0_5, %c0_6], %7 {strides = array<i32>} : memref<1x128x128xf32, #tpu.memory_space<vmem>>, vector<1x128x128xf32>,
    return
  }
  func.func @transform_0(%arg0: i32, %arg1: i32) -> (i32, i32) {
    %c0_i32 = arith.constant 0 : i32
    %c0_i32_0 = arith.constant 0 : i32
    %c0_i32_1 = arith.constant 0 : i32
    return %c0_i32, %c0_i32_0 : i32, i32
  }
  func.func @transform_1(%arg0: i32, %arg1: i32) -> (i32, i32, i32) {
    %c0_i32 = arith.constant 0 : i32
    %c0_i32_0 = arith.constant 0 : i32
    return %arg0, %c0_i32, %arg1 : i32, i32, i32
  }
  func.func @transform_2(%arg0: i32, %arg1: i32) -> (i32, i32, i32) {
    %c0_i32 = arith.constant 0 : i32
    %c0_i32_0 = arith.constant 0 : i32
    return %arg0, %arg1, %c0_i32 : i32, i32, i32
  }
}

</mosaic_0001>

<bundles_post_ra>
// kernel: tpu_custom_call.1
= control target key start
LH: loop header
LB: loop body
LE: loop exit
PB: predicated region body
PF: predicated region fallthrough
CT: control target
= control target key end

     0   :  { %7 = vsyncpa [#allocation3], 0  ;;  %s968_s0 = inlined_call_operand.hbm [shape: f32[128,128], index: 0, kind: input, shape index: {}]   ;;  %s969_s1 = inlined_call_operand.hbm [shape: f32[2,128,128], index: 1, kind: input, shape index: {}]   ;;  %s970_s2 = inlined_call_operand.hbm [shape: f32[2,128,128], index: 2, kind: output, shape index: {}]  }
   0x1   :  { %8 = vsyncpa [#allocation6], 0 }
   0x2   :  { %10 = vsyncpa [#allocation6 + $0x1], 0 }
   0x3   :  { %11 = vsyncpa [#allocation4], 0 }
   0x4   :  { %13 = vsyncpa [#allocation4 + $0x1], 0  ;;  %s772_s9 = smov 0   ;;  %s774_s10 = smov 0  }
   0x5   :  { %s776_s11 = smov 0   ;;  %s778_s12 = smov 0  }
   0x6   :  { %s780_s13 = smov 0   ;;  %s782_s14 = smov 0  }
   0x7 LB: > { %s460_s15 = sadd.s32 4294967295, %s750_s14   ;;  %s461_s16 = sadd.s32 4294967294, %s750_s14   ;;  %s750_s14 = sphi %s782_s14, %s19_s14   ;;  %s746_s13 = sphi %s780_s13, %s982_s13   ;;  %s742_s12 = sphi %s778_s12, %s981_s12   ;;  %s738_s11 = sphi %s776_s11, %s980_s11   ;;  %s734_s10 = sphi %s774_s10, %s979_s10   ;;  %s730_s9 = sphi %s772_s9, %s978_s9  }
   0x8   : > { %p74_p0 = scmp.ne.s32.totalorder %s734_s10, %s730_s9  ;;  %p806_p1 = scmp.eq.s32.totalorder %s460_s15, 0 }
   0x9   : > { %p810_p2 = scmp.eq.s32.totalorder %s460_s15, 1  ;;  %p106_p3 = scmp.eq.s32.totalorder %s461_s16, 1 }
   0xa   : > { %p816_p4 = por %p806_p1, %p74_p0  ;;  %p462_p5 = scmp.ge.s32.totalorder %s750_s14, 1 }
   0xb   : > { %p821_p6 = por %p106_p3, %p74_p0  ;;  %p113_p7 = scmp.lt.s32.totalorder %s750_s14, 3 }
   0xc   : > { %s124_s23 = sshll.u32 %s968_s0, 4  ;;  %s752_s25 = smov [#allocation2]   ;;  %s125_s23 = int_to_ptr.hbm [resolvable:$true] %s124_s23 }
   0xd   : > { %p829_p8 = pnand %p462_p5, %p113_p7  ;;  %s126_s26 = sshll.u32 %s752_s25, 4  ;;  %s127_s26 = int_to_ptr.vmem [resolvable:$true] %s126_s26 }
   0xe   : > { %p464_p11 = scmp.ge.s32.totalorder %s750_s14, 2  ;;  %s753_s27 = smov 128  }
   0xf   : > { %p535_p9 = pneg %p829_p8  ;;  %s754_s28 = smov 8  }
  0x10   : > { %s31_s29 = sadd.s32 1, %s746_s13  ;;  %s61_s30 = sadd.s32 1, %s738_s11 }
  0x11   : > { %p536_p10 = pnand %p535_p9, %p806_p1  ;;  %p33_p12 = scmp.ge.s32.totalorder %s31_s29, 2 }
  0x12   : > { %p68_p13 = scmp.ne.s32.totalorder %s738_s11, %s734_s10  ;;  %p69_p0 = scmp.eq.s32.totalorder %s750_s14, 0 }
  0x13   : > { %538 = dma.hbm_to_vmem [thread:$0]  (!%p536_p10), %s125_s23, 2048, %s127_s26, [#allocation3], %s753_s27, %s753_s27, %s754_s28  }
  0x14   : > { %s984_s29 = smov (%p33_p12, %s31_s29), 0  ;;  %p848_p3 = por %p69_p0, %p68_p13 }
  0x15   : > { %p854_p5 = por %p810_p2, %p68_p13  ;;  %s56_s5 = ssub.s32 %s746_s13, %s984_s29 }
  0x16   : > { %p548_p7 = scmp.lt.s32.totalorder %s750_s14, 2  ;;  %p59_p9 = scmp.eq.s32.totalorder %s56_s5, 0 }
  0x17   : > { %s140_s6 = sand.u32 1, %s738_s11   ;;  %s477_s15 = sshll.u32 %s746_s13, 7 }
  0x18   : > { %s465_s7 = sshll.u32 %s140_s6, 7  ;;  %s150_s22 = scalar_lea.hbm %s969_s1, %s477_s15 }
  0x19   : > { %s863_s8 = scalar_select %p59_p9, %s738_s11, %s61_s30  }
  0x1a   : > { %s144_s23 = scalar_lea.vmem [#allocation5], %s465_s7  ;;  %s151_s18 = sshll.u32 %s150_s22, 4  ;;  %s152_s18 = int_to_ptr.hbm [resolvable:$true] %s151_s18 }
  0x1b   : > { %s153_s25 = sshll.u32 %s144_s23, 4  ;;  %p540_p2 = pnand %p548_p7, %p848_p3  ;;  %s154_s25 = int_to_ptr.vmem [resolvable:$true] %s153_s25 }
  0x1c   : > { %s141_s26 = scalar_lea.sflag [#allocation6], %s140_s6  ;;  %165 = sbr.rel (%p829_p8) target bundleno = 485 (0x1e5), region = 28 }
  0x1d   : > { %542 = dma.hbm_to_vmem [thread:$0]  (!%p540_p2), %s152_s18, 2048, %s154_s25, %s141_s26, %s753_s27, %s753_s27, %s754_s28  }
  0x21   : > { %717 = dma.done.wait (%p806_p1), [#allocation3], 2048  }
  0x22   : > { %719 = vsyncadd (%p806_p1), [#allocation3], 4294965248  ;;  %s881_s30 = sand.u32 1, %s734_s10  }
  0x23   : > { %s470_s3 = sshll.u32 %s881_s30, 7  ;;  %s173_s5 = scalar_lea.sflag [#allocation6], %s881_s30 }
  0x24   : > { %s887_s27 = scalar_lea.vmem [#allocation5], %s470_s3 }
  0x25   : > { %721 = dma.done.wait (%p816_p4), %s173_s5, 2048  }
  0x26   : > { %723 = vsyncadd (%p816_p4), %s173_s5, 4294965248  ;;  %v230_v0 = vld [vmem:[%s887_s27 + $0x78] sm:$0xff]  ;;  %v229_v1 = vld [vmem:[%s887_s27 + $0x70] sm:$0xff]  ;;  %s911_s17 = scalar_lea.vmem [#allocation7], %s470_s3  ;;  %s478_s19 = sshll.u32 %s742_s12, 7 }
  0x27   : > { %231 = vmatpush.msra.mxu0 %v230_v0  ;;  %479 = vmatpush.msra.mxu1 %v230_v0  ;;  %v228_v2 = vld [vmem:[%s887_s27 + $0x68] sm:$0xff]  ;;  %v227_v3 = vld [vmem:[%s887_s27 + $0x60] sm:$0xff]  ;;  %v226_v4 = vld [vmem:[%s887_s27 + $0x58] sm:$0xff]  ;;  %s358_s6 = scalar_lea.hbm %s970_s2, %s478_s19  ;;  %s359_s7 = sshll.u32 %s911_s17, 4  ;;  %s360_s7 = int_to_ptr.vmem [resolvable:$true] %s359_s7 }
  0x28   : > { %480 = vmatpush.msra.mxu2 %v230_v0  ;;  %481 = vmatpush.msra.mxu3 %v230_v0  ;;  %v225_v5 = vld [vmem:[%s887_s27 + $0x50] sm:$0xff]  ;;  %v224_v6 = vld [vmem:[%s887_s27 + $0x48] sm:$0xff]  ;;  %v223_v7 = vld [vmem:[%s887_s27 + $0x40] sm:$0xff]  ;;  %s361_s15 = sshll.u32 %s358_s6, 4  ;;  %s345_s16 = scalar_lea.sflag [#allocation4], %s881_s30  ;;  %s362_s15 = int_to_ptr.hbm [resolvable:$true] %s361_s15 }
  0x29   : > { %232 = vmatpush.msra.mxu0 %v229_v1  ;;  %482 = vmatpush.msra.mxu1 %v229_v1  ;;  %v222_v8 = vld [vmem:[%s887_s27 + $0x38] sm:$0xff]  ;;  %v221_v9 = vld [vmem:[%s887_s27 + $0x30] sm:$0xff]  ;;  %v220_v10 = vld [vmem:[%s887_s27 + $0x28] sm:$0xff]  ;;  %s678_s21 = sshra.s32 %s362_s15, 4  ;;  %s684_s25 = scalar_lea.hbm %s970_s2, 256  ;;  %s679_s21 = int_to_ptr.hbm [resolvable:$true] %s678_s21 }
  0x2a   : > { %483 = vmatpush.msra.mxu2 %v229_v1  ;;  %484 = vmatpush.msra.mxu3 %v229_v1  ;;  %v219_v11 = vld [vmem:[%s887_s27 + $0x20] sm:$0xff]  ;;  %v218_v12 = vld [vmem:[%s887_s27 + $0x18] sm:$0xff]  ;;  %v217_v13 = vld [vmem:[%s887_s27 + $0x10] sm:$0xff]  ;;  %s680_s22 = scalar_lea.hbm %s679_s21, 128  ;;  %p685_p10 = scmp.lt.s32.totalorder %s679_s21, %s970_s2 }
  0x2b   : > { %233 = vmatpush.msra.mxu0 %v228_v2  ;;  %485 = vmatpush.msra.mxu1 %v228_v2  ;;  %v216_v14 = vld [vmem:[%s887_s27 + $0x8] sm:$0xff]  ;;  %v215_v15 = vld [vmem:[%s887_s27] sm:$0xff]  ;;  %v201_v24 = vld [vmem:[#allocation2 + $0x10] sm:$0xff]  ;;  %p681_p1 = scmp.ne.s32.totalorder %s679_s21, %s680_s22  ;;  %p686_p12 = scmp.lt.s32.totalorder %s684_s25, %s680_s22 }
  0x2c   : > { %486 = vmatpush.msra.mxu2 %v228_v2  ;;  %487 = vmatpush.msra.mxu3 %v228_v2  ;;  %v199_v16 = vld [vmem:[#allocation2] sm:$0xff]  ;;  %v200_v20 = vld [vmem:[#allocation2 + $0x8] sm:$0xff]  ;;  %v205_v25 = vld [vmem:[#allocation2 + $0x30] sm:$0xff] }
  0x2d   : > { %234 = vmatpush.msra.mxu0 %v227_v3  ;;  %488 = vmatpush.msra.mxu1 %v227_v3  ;;  %v203_v17 = vld [vmem:[#allocation2 + $0x20] sm:$0xff]  ;;  %v204_v21 = vld [vmem:[#allocation2 + $0x28] sm:$0xff]  ;;  %v209_v26 = vld [vmem:[#allocation2 + $0x50] sm:$0xff]  ;;  %p682_p4 = pnand %p681_p1, %p854_p5  ;;  %p687_p13 = por %p686_p12, %p685_p10 }
  0x2e   : > { %489 = vmatpush.msra.mxu2 %v227_v3  ;;  %490 = vmatpush.msra.mxu3 %v227_v3  ;;  %v207_v18 = vld [vmem:[#allocation2 + $0x40] sm:$0xff]  ;;  %v208_v22 = vld [vmem:[#allocation2 + $0x48] sm:$0xff]  ;;  %v213_v27 = vld [vmem:[#allocation2 + $0x70] sm:$0xff] }
  0x2f   : > { %235 = vmatpush.msra.mxu0 %v226_v4  ;;  %491 = vmatpush.msra.mxu1 %v226_v4  ;;  %v211_v19 = vld [vmem:[#allocation2 + $0x60] sm:$0xff]  ;;  %v212_v23 = vld [vmem:[#allocation2 + $0x68] sm:$0xff]  ;;  %v202_v28 = vld [vmem:[#allocation2 + $0x18] sm:$0xff]  ;;  %p683_p8 = pneg %p682_p4 }
  0x30   : > { %492 = vmatpush.msra.mxu2 %v226_v4  ;;  %493 = vmatpush.msra.mxu3 %v226_v4  ;;  %v206_v29 = vld [vmem:[#allocation2 + $0x38] sm:$0xff] }
  0x31   : > { %236 = vmatpush.msra.mxu0 %v225_v5  ;;  %494 = vmatpush.msra.mxu1 %v225_v5  ;;  %v210_v30 = vld [vmem:[#allocation2 + $0x58] sm:$0xff]  ;;  %p688_p0 = pnand %p687_p13, %p683_p8 }
  0x32   : > { %495 = vmatpush.msra.mxu2 %v225_v5  ;;  %496 = vmatpush.msra.mxu3 %v225_v5  ;;  %v214_v31 = vld [vmem:[#allocation2 + $0x78] sm:$0xff] }
  0x33   : > { %237 = vmatpush.msra.mxu0 %v224_v6  ;;  %497 = vmatpush.msra.mxu1 %v224_v6 }
  0x34   : > { %498 = vmatpush.msra.mxu2 %v224_v6  ;;  %499 = vmatpush.msra.mxu3 %v224_v6 }
  0x35   : > { %238 = vmatpush.msra.mxu0 %v223_v7  ;;  %500 = vmatpush.msra.mxu1 %v223_v7 }
  0x36   : > { %501 = vmatpush.msra.mxu2 %v223_v7  ;;  %502 = vmatpush.msra.mxu3 %v223_v7 }
  0x37   : > { %239 = vmatpush.msra.mxu0 %v222_v8  ;;  %503 = vmatpush.msra.mxu1 %v222_v8 }
  0x38   : > { %504 = vmatpush.msra.mxu2 %v222_v8  ;;  %505 = vmatpush.msra.mxu3 %v222_v8 }
  0x39   : > { %240 = vmatpush.msra.mxu0 %v221_v9  ;;  %506 = vmatpush.msra.mxu1 %v221_v9 }
  0x3a   : > { %507 = vmatpush.msra.mxu2 %v221_v9  ;;  %508 = vmatpush.msra.mxu3 %v221_v9 }
  0x3b   : > { %241 = vmatpush.msra.mxu0 %v220_v10  ;;  %509 = vmatpush.msra.mxu1 %v220_v10 }
  0x3c   : > { %510 = vmatpush.msra.mxu2 %v220_v10  ;;  %511 = vmatpush.msra.mxu3 %v220_v10 }
  0x3d   : > { %242 = vmatpush.msra.mxu0 %v219_v11  ;;  %512 = vmatpush.msra.mxu1 %v219_v11 }
  0x3e   : > { %513 = vmatpush.msra.mxu2 %v219_v11  ;;  %514 = vmatpush.msra.mxu3 %v219_v11 }
  0x3f   : > { %243 = vmatpush.msra.mxu0 %v218_v12  ;;  %515 = vmatpush.msra.mxu1 %v218_v12 }
  0x40   : > { %516 = vmatpush.msra.mxu2 %v218_v12  ;;  %517 = vmatpush.msra.mxu3 %v218_v12 }
  0x41   : > { %244 = vmatpush.msra.mxu0 %v217_v13  ;;  %518 = vmatpush.msra.mxu1 %v217_v13 }
  0x42   : > { %519 = vmatpush.msra.mxu2 %v217_v13  ;;  %520 = vmatpush.msra.mxu3 %v217_v13 }
  0x43   : > { %245 = vmatpush.msra.mxu0 %v216_v14  ;;  %521 = vmatpush.msra.mxu1 %v216_v14 }
  0x44   : > { %522 = vmatpush.msra.mxu2 %v216_v14  ;;  %523 = vmatpush.msra.mxu3 %v216_v14 }
  0x45   : > { %246 = vmatpush.msra.mxu0 %v215_v15  ;;  %524 = vmatpush.msra.mxu1 %v215_v15 }
  0x46   : > { %247 = vmatmul.f32.vlgmr.msra.gmra.mxu0 %v199_v16  ;;  %259 = vmatmul.f32.vlgmr.msra.gmra.mxu1 %v203_v17 }
  0x47   : > { %525 = vmatpush.msra.mxu2 %v215_v15  ;;  %526 = vmatpush.msra.mxu3 %v215_v15 }
  0x48   : > { %271 = vmatmul.f32.vlgmr.msra.gmra.mxu2 %v207_v18  ;;  %283 = vmatmul.f32.vlgmr.msra.gmra.mxu3 %v211_v19 }
  0x4e   : > { %250 = vmatmul.f32.gmra.mxu0 %v200_v20  ;;  %262 = vmatmul.f32.gmra.mxu1 %v204_v21 }
  0x50   : > { %274 = vmatmul.f32.gmra.mxu2 %v208_v22  ;;  %286 = vmatmul.f32.gmra.mxu3 %v212_v23 }
  0x56   : > { %253 = vmatmul.f32.gmra.mxu0 %v201_v24  ;;  %265 = vmatmul.f32.gmra.mxu1 %v205_v25 }
  0x58   : > { %277 = vmatmul.f32.gmra.mxu2 %v209_v26  ;;  %289 = vmatmul.f32.gmra.mxu3 %v213_v27 }
  0x5e   : > { %256 = vmatmul.f32.gmra.mxu0 %v202_v28  ;;  %268 = vmatmul.f32.gmra.mxu1 %v206_v29 }
  0x60   : > { %280 = vmatmul.f32.gmra.mxu2 %v210_v30  ;;  %292 = vmatmul.f32.gmra.mxu3 %v214_v31 }
  0xc3   : > { %v248_v32 = vpop.f32.mrf.mxu0  ;;  %v260_v36 = vpop.f32.mrf.mxu1 }
  0xc4   : > { %296 = vxpose.xlu0.b32.start [1/16] %v248_v32, 128 }
  0xcb   : > { %v251_v33 = vpop.f32.mrf.mxu0  ;;  %v263_v37 = vpop.f32.mrf.mxu1 }
  0xcc   : > { %297 = vxpose.xlu0.b32.cont [2/16] %v251_v33, 128  ;;  %v272_v40 = vpop.f32.mrf.mxu2  ;;  %v284_v44 = vpop.f32.mrf.mxu3 }
  0xd3   : > { %v254_v34 = vpop.f32.mrf.mxu0  ;;  %v266_v38 = vpop.f32.mrf.mxu1 }
  0xd4   : > { %298 = vxpose.xlu0.b32.cont [3/16] %v254_v34, 128  ;;  %v275_v41 = vpop.f32.mrf.mxu2  ;;  %v287_v45 = vpop.f32.mrf.mxu3 }
  0xdb   : > { %v257_v35 = vpop.f32.mrf.mxu0  ;;  %v269_v39 = vpop.f32.mrf.mxu1 }
  0xdc   : > { %299 = vxpose.xlu0.b32.cont [4/16] %v257_v35, 128  ;;  %v278_v42 = vpop.f32.mrf.mxu2  ;;  %v290_v46 = vpop.f32.mrf.mxu3 }
  0xe4   : > { %300 = vxpose.xlu0.b32.cont [5/16] %v260_v36, 128  ;;  %v281_v43 = vpop.f32.mrf.mxu2  ;;  %v293_v47 = vpop.f32.mrf.mxu3 }
  0xec   : > { %301 = vxpose.xlu0.b32.cont [6/16] %v263_v37, 128 }
  0xf4   : > { %302 = vxpose.xlu0.b32.cont [7/16] %v266_v38, 128 }
  0xfc   : > { %303 = vxpose.xlu0.b32.cont [8/16] %v269_v39, 128 }
 0x104   : > { %304 = vxpose.xlu0.b32.cont [9/16] %v272_v40, 128 }
 0x10c   : > { %305 = vxpose.xlu0.b32.cont [10/16] %v275_v41, 128 }
 0x114   : > { %306 = vxpose.xlu0.b32.cont [11/16] %v278_v42, 128 }
 0x11c   : > { %307 = vxpose.xlu0.b32.cont [12/16] %v281_v43, 128 }
 0x124   : > { %308 = vxpose.xlu0.b32.cont [13/16] %v284_v44, 128 }
 0x12c   : > { %309 = vxpose.xlu0.b32.cont [14/16] %v287_v45, 128 }
 0x134   : > { %310 = vxpose.xlu0.b32.cont [15/16] %v290_v46, 128 }
 0x13c   : > { %311 = vxpose.xlu0.b32.end [16/16] %v293_v47, 128 }
 0x168   : > { %v312_v48 = vpop.trf.xlu0 }
 0x169   : > { %328 = vst [vmem:[%s911_s17] sm:$0xff] %v312_v48 }
 0x170   : > { %v313_v49 = vpop.trf.xlu0 }
 0x171   : > { %329 = vst [vmem:[%s911_s17 + $0x8] sm:$0xff] %v313_v49 }
 0x178   : > { %v314_v50 = vpop.trf.xlu0 }
 0x179   : > { %330 = vst [vmem:[%s911_s17 + $0x10] sm:$0xff] %v314_v50 }
 0x180   : > { %v315_v51 = vpop.trf.xlu0 }
 0x181   : > { %331 = vst [vmem:[%s911_s17 + $0x18] sm:$0xff] %v315_v51 }
 0x188   : > { %v316_v52 = vpop.trf.xlu0 }
 0x189   : > { %332 = vst [vmem:[%s911_s17 + $0x20] sm:$0xff] %v316_v52 }
 0x190   : > { %v317_v53 = vpop.trf.xlu0 }
 0x191   : > { %333 = vst [vmem:[%s911_s17 + $0x28] sm:$0xff] %v317_v53 }
 0x198   : > { %v318_v54 = vpop.trf.xlu0 }
 0x199   : > { %334 = vst [vmem:[%s911_s17 + $0x30] sm:$0xff] %v318_v54 }
 0x1a0   : > { %v319_v55 = vpop.trf.xlu0 }
 0x1a1   : > { %335 = vst [vmem:[%s911_s17 + $0x38] sm:$0xff] %v319_v55 }
 0x1a8   : > { %v320_v56 = vpop.trf.xlu0 }
 0x1a9   : > { %336 = vst [vmem:[%s911_s17 + $0x40] sm:$0xff] %v320_v56 }
 0x1b0   : > { %v321_v57 = vpop.trf.xlu0 }
 0x1b1   : > { %337 = vst [vmem:[%s911_s17 + $0x48] sm:$0xff] %v321_v57 }
 0x1b8   : > { %v322_v58 = vpop.trf.xlu0 }
 0x1b9   : > { %338 = vst [vmem:[%s911_s17 + $0x50] sm:$0xff] %v322_v58 }
 0x1c0   : > { %v323_v59 = vpop.trf.xlu0 }
 0x1c1   : > { %339 = vst [vmem:[%s911_s17 + $0x58] sm:$0xff] %v323_v59 }
 0x1c8   : > { %v324_v60 = vpop.trf.xlu0 }
 0x1c9   : > { %340 = vst [vmem:[%s911_s17 + $0x60] sm:$0xff] %v324_v60 }
 0x1d0   : > { %v325_v61 = vpop.trf.xlu0 }
 0x1d1   : > { %341 = vst [vmem:[%s911_s17 + $0x68] sm:$0xff] %v325_v61 }
 0x1d8   : > { %v326_v62 = vpop.trf.xlu0 }
 0x1d9   : > { %342 = vst [vmem:[%s911_s17 + $0x70] sm:$0xff] %v326_v62 }
 0x1e0   : > { %v327_v63 = vpop.trf.xlu0 }
 0x1e1   : > { %343 = vst [vmem:[%s911_s17 + $0x78] sm:$0xff] %v327_v63 }
 0x1e2   : > { %691 = shalt.err (!%p688_p0)
}
 0x1e3   : > { %s755_s30 = smov 128   ;;  %s756_s3 = smov 8  }
 0x1e4   : > { %533 = dma.vmem_to_hbm [thread:$0]  (%p854_p5), %s360_s7, 2048, %s362_s15, %s345_s16, %s755_s30, %s755_s30, %s756_s3  }
 0x1e5 PF: > { %s376_s5 = sand.u32 1, %s730_s9   ;;  %p544_p3 = pnand %p464_p11, %p821_p6 }
 0x1e6   : > { %s377_s27 = scalar_lea.sflag [#allocation4], %s376_s5 }
 0x1e7   : > { %p545_p7 = pneg %p544_p3 }
 0x1e9   : > { %725 = dma.done.wait (%p545_p7), %s377_s27, 2048  }
 0x1ea   : > { %727 = vsyncadd (%p545_p7), %s377_s27, 4294965248  ;;  %s19_s14 = sadd.s32 1, %s750_s14   ;;  %s978_s9 = smov %s734_s10 }
 0x1eb   : > { %p16_p9 = scmp.ge.s32.totalorder %s19_s14, 4   ;;  %s979_s10 = smov %s738_s11 }
 0x1ec   : > { %s980_s11 = smov %s863_s8  ;;  %s981_s12 = smov %s746_s13 }
 0x1ed   : > { %s982_s13 = smov %s984_s29  ;;  %18 = sbr.rel (!%p16_p9) target bundleno = 7 (0x7), region = 78 }
 0x1f2   :  { %383 = vsyncpa [#allocation3], 1 }
 0x1f3   :  { %385 = vsyncpa [#allocation3 + $0x1], 1 }
 0x1f4   :  { %386 = vsyncpa [#allocation6], 1 }
 0x1f5   :  { %388 = vsyncpa [#allocation6 + $0x1], 1 }
 0x1f6   :  { %389 = vsyncpa [#allocation4], 1 }
 0x1f7   :  { %391 = vsyncpa [#allocation4 + $0x1], 1 }

</bundles_post_ra>
